<compile_context>
chip_gen: v7x
topology: tpu7x:2x2x1
jax: 0.10.0
libtpu: 0.0.40
codegen_flags: <defaults>
</compile_context>

<pallas_src>
import jax
import jax.numpy as jnp
from jax.experimental import pallas as pl
from jax.experimental.pallas import tpu as pltpu


def _copy_kernel(x_ref, o_ref):
    # Identity pass-through; the "unflatten" itself is pure layout metadata.
    o_ref[...] = x_ref[...]


def _sublane_multiple(dtype):
    itemsize = jnp.dtype(dtype).itemsize
    return max(8, 8 * (4 // max(1, itemsize)))  # 8 f32 / 16 bf16 / 32 int8


def _lane_dense_shape(n_elems, lane_cap=2048):
    """Largest (rows, lanes) factorization of n_elems with lanes % 128 == 0."""
    for lanes in range(lane_cap, 127, -128):
        if n_elems % lanes == 0:
            return n_elems // lanes, lanes
    return None


def _pallas_copy(x2d, *, gridless_max_bytes=4 << 20,
                 tile_budget_bytes=4 << 20, min_steps=8):
    """Identity copy of a 2-D array through a Pallas kernel."""
    R, L = x2d.shape
    itemsize = jnp.dtype(x2d.dtype).itemsize
    total_bytes = R * L * itemsize

    if total_bytes <= gridless_max_bytes:
        # Small case: gridless, single-buffered, whole array resident in VMEM.
        # Input + output at this gate fit every generation's scoped VMEM
        # default (16 MiB v5e, 32 MiB v6e/v7x) with large headroom.
        return pl.pallas_call(
            _copy_kernel,
            out_shape=jax.ShapeDtypeStruct((R, L), x2d.dtype),
            in_specs=[pl.BlockSpec(memory_space=pltpu.MemorySpace.VMEM)],
            out_specs=pl.BlockSpec(memory_space=pltpu.MemorySpace.VMEM),
        )(x2d)

    # Tiled path: pipeline holds 2 input + 2 output buffers, so keep one tile
    # at <= tile_budget_bytes; also ensure >= min_steps grid steps for overlap.
    sub = _sublane_multiple(x2d.dtype)
    row_bytes = max(1, L * itemsize)
    by_budget = max(sub, (tile_budget_bytes // row_bytes) // sub * sub)
    by_steps = max(sub, (pl.cdiv(R, min_steps) + sub - 1) // sub * sub)
    rb = min(by_budget, by_steps, R)
    rb = max(sub, rb // sub * sub) if R >= sub else R

    grid = (pl.cdiv(R, rb),)  # ragged last block OK: OOB writes are dropped
    return pl.pallas_call(
        _copy_kernel,
        out_shape=jax.ShapeDtypeStruct((R, L), x2d.dtype),
        grid=grid,
        in_specs=[pl.BlockSpec((rb, L), lambda i: (i, 0))],
        out_specs=pl.BlockSpec((rb, L), lambda i: (i, 0)),
        compiler_params=pltpu.CompilerParams(
            dimension_semantics=("parallel",)),  # v7x: split rows across 2 TCs
    )(x2d)


def unflatten(x, type='3d', materialize=False, **copy_kwargs):
    """JAX/Pallas equivalent of UnFlatten.forward.

    x           : array with numel == B * C (leading dims (B, C), any trailing
                  dims must be singletons), matching torch .view constraints.
    type        : '3d' -> (B, C, 1, 1, 1), anything else -> (B, C, 1, 1)
    materialize : False (default) -> pure metadata reshape (zero-cost view).
                  True -> route the data through a Pallas identity-copy kernel
                  (for callers that need a fresh, materialized buffer).
    """
    B, C = x.shape[0], x.shape[1]
    assert x.size == B * C, "UnFlatten expects input.numel() == B * C"
    out_shape = (B, C, 1, 1, 1) if type == '3d' else (B, C, 1, 1)

    if not materialize:
        # Dominant optimization: pure reshape; XLA lowers to a bitcast/view.
        return x.reshape(out_shape)

    # Present a lane-dense slab to the kernel when B*C permits (pure copy, so
    # the 2-D working shape is arbitrary); otherwise copy as (B, C).
    dense = _lane_dense_shape(B * C)
    x2d = x.reshape(dense) if dense is not None else x.reshape(B, C)
    out = _pallas_copy(x2d, **copy_kwargs)
    return out.reshape(out_shape)


def _reference(x, type='3d'):
    B, C = x.shape[0], x.shape[1]
    return x.reshape((B, C, 1, 1, 1) if type == '3d' else (B, C, 1, 1))


if __name__ == "__main__":
    key = jax.random.PRNGKey(0)
    k1, k2, k3 = jax.random.split(key, 3)

    # 1) Default path: pure reshape (no kernel), both module variants.
    x0 = jax.random.normal(k1, (2, 512), jnp.float32)
    o3 = unflatten(x0, type='3d')
    o2 = unflatten(x0, type='2d')
    jax.block_until_ready((o3, o2))
    assert o3.shape == (2, 512, 1, 1, 1) and jnp.array_equal(o3, _reference(x0, '3d'))
    assert o2.shape == (2, 512, 1, 1) and jnp.array_equal(o2, _reference(x0, '2d'))

    # 2) Materialized Pallas copy: gridless, lane-dense repack (B*C = 1024).
    o3m = unflatten(x0, type='3d', materialize=True)
    jax.block_until_ready(o3m)
    assert o3m.shape == (2, 512, 1, 1, 1)
    assert jnp.array_equal(o3m, _reference(x0, '3d'))

    # 3) Materialized copy with C not a multiple of 128 (no repack possible):
    #    full-array VMEM block, still correct.
    x1 = jax.random.normal(k2, (3, 33), jnp.float32)
    o2m = unflatten(x1, type='2d', materialize=True)
    jax.block_until_ready(o2m)
    assert o2m.shape == (3, 33, 1, 1)
    assert jnp.array_equal(o2m, _reference(x1, '2d'))

    # 4) Exercise the tiled pipelined branch on a modest array by lowering the
    #    byte gates (keeps the test small while covering the large-array path).
    x2 = jax.random.normal(k3, (64, 512), jnp.float32)  # 128 KiB total
    o_t = unflatten(x2, type='3d', materialize=True,
                    gridless_max_bytes=16 << 10,
                    tile_budget_bytes=16 << 10,
                    min_steps=4)
    jax.block_until_ready(o_t)
    assert o_t.shape == (64, 512, 1, 1, 1)
    assert jnp.array_equal(o_t, _reference(x2, '3d'))

    print("KERNEL_OK")
</pallas_src>

<mosaic_0001>
module attributes {stable_mosaic.version = 11 : i64} {
  func.func @_copy_kernel(%arg0: memref<1x1024xf32, #tpu.memory_space<vmem>>, %arg1: memref<1x1024xf32, #tpu.memory_space<vmem>>) attributes {dimension_semantics = [], scalar_prefetch = 0 : i64, scratch_operands = 0 : i64, tpu.core_type = #tpu.core_type<tc>} {
    %c0 = arith.constant 0 : index
    %c0_0 = arith.constant 0 : index
    %0 = vector.load %arg0[%c0, %c0_0] : memref<1x1024xf32, #tpu.memory_space<vmem>>, vector<1x1024xf32>
    %c0_1 = arith.constant 0 : index
    %c0_2 = arith.constant 0 : index
    %1 = vector.load %arg1[%c0_1, %c0_2] : memref<1x1024xf32, #tpu.memory_space<vmem>>, vector<1x1024xf32>
    tpu.vector_store %arg1[%c0_1, %c0_2], %0 {strides = array<i32>} : memref<1x1024xf32, #tpu.memory_space<vmem>>, vector<1x1024xf32>,
    return
  }
}

</mosaic_0001>

<bundles_post_ra>
// kernel: tpu_custom_call.1
= control target key start
LH: loop header
LB: loop body
LE: loop exit
PB: predicated region body
PF: predicated region fallthrough
CT: control target
= control target key end

     0   :  { %6 = vsyncpa [#allocation3], 0  ;;  %s124_s0 = inlined_call_operand.hbm [shape: f32[1,1024], index: 0, kind: input, shape index: {}]   ;;  %s125_s1 = inlined_call_operand.hbm [shape: f32[1,1024], index: 1, kind: output, shape index: {}]  }
   0x1   :  { %7 = vsyncpa [#allocation4], 0  ;;  %s88_s6 = smov [#allocation2]   ;;  %s40_s10 = scalar_lea.hbm %s124_s0, 128 }
   0x2   :  { %s14_s7 = sshll.u32 %s88_s6, 4  ;;  %p41_p0 = scmp.ne.s32.totalorder %s124_s0, %s40_s10  ;;  %s15_s7 = int_to_ptr.vmem [resolvable:$true] %s14_s7 }
   0x3   :  { %p44_p1 = scmp.lt.u32.totalorder %s40_s10, %s124_s0 }
   0x5   :  { %p46_p2 = pnand %p44_p1, %p41_p0 }
   0x7   :  { %49 = shalt.err (!%p46_p2)
}
   0x8   :  { %s50_s15 = scalar_lea.vmem %s15_s7, 128  ;;  %p55_p4 = scmp.lt.s32.totalorder %s15_s7, %s15_s7 }
   0x9   :  { %p51_p3 = scmp.ne.s32.totalorder %s15_s7, %s50_s15  ;;  %p56_p5 = scmp.lt.s32.totalorder %s50_s15, %s50_s15 }
   0xb   :  { %p57_p6 = por %p56_p5, %p55_p4 }
   0xd   :  { %p58_p7 = pnand %p57_p6, %p51_p3 }
   0xf   :  { %61 = shalt.err (!%p58_p7)
}
  0x10   :  { %17 = dma.hbm_to_vmem [thread:$0]  %s124_s0, 128, %s15_s7, [#allocation3]  }
  0x11   :  { %84 = dma.done.wait [#allocation3], 128  }
  0x12   :  { %85 = vsyncadd [#allocation3], 4294967168  ;;  %s89_s18 = smov [#allocation5]   ;;  %v21_v0 = vld [vmem:[#allocation2] sm:$0xff] }
  0x13   :  { %s29_s19 = sshll.u32 %s89_s18, 4  ;;  %22 = vst [vmem:[#allocation5] sm:$0xff] %v21_v0  ;;  %s30_s19 = int_to_ptr.vmem [resolvable:$true] %s29_s19 }
  0x14   :  { %s62_s20 = scalar_lea.vmem %s30_s19, 128  ;;  %p67_p9 = scmp.lt.s32.totalorder %s30_s19, %s30_s19 }
  0x15   :  { %p63_p8 = scmp.ne.s32.totalorder %s30_s19, %s62_s20  ;;  %p68_p10 = scmp.lt.s32.totalorder %s62_s20, %s62_s20 }
  0x17   :  { %p69_p11 = por %p68_p10, %p67_p9 }
  0x19   :  { %p70_p12 = pnand %p69_p11, %p63_p8 }
  0x1b   :  { %73 = shalt.err (!%p70_p12)
}
  0x1c   :  { %s74_s23 = scalar_lea.hbm %s125_s1, 128 }
  0x1d   :  { %p75_p13 = scmp.ne.s32.totalorder %s125_s1, %s74_s23  ;;  %p78_p0 = scmp.lt.u32.totalorder %s74_s23, %s125_s1 }
  0x1f   :  { %p80_p1 = pnand %p78_p0, %p75_p13 }
  0x21   :  { %83 = shalt.err (!%p80_p1)
}
  0x22   :  { %32 = dma.vmem_to_hbm [thread:$0]  %s30_s19, 128, %s125_s1, [#allocation4]  }
  0x23   :  { %86 = dma.done.wait [#allocation4], 128  }
  0x24   :  { %87 = vsyncadd [#allocation4], 4294967168 }
  0x25   :  { %36 = vsyncpa [#allocation3], 1 }
  0x26   :  { %37 = vsyncpa [#allocation4], 1 }

</bundles_post_ra>
